<compile_context>
chip_gen: v7x
topology: tpu7x:2x2x1
jax: 0.10.0
libtpu: 0.0.40
codegen_flags: <defaults>
</compile_context>

<pallas_src>
import jax
import jax.numpy as jnp
from jax.experimental import pallas as pl
from jax.experimental.pallas import tpu as pltpu

_VMEM_LIMIT = 48 * 1024 * 1024  # > scoped defaults (16/32 MiB), < v7x physical 64 MiB


def _pick_tile(n: int, preferred: int = 128) -> int:
    """Largest tile <= preferred that divides n (demo shapes are tiny)."""
    if n <= preferred:
        return n
    t = preferred
    while n % t:
        t //= 2
    return max(t, 1)


# ---------------------------------------------------------------------------
# Kernel 1: fused QKV projection, heads kept on a leading dim.
# ---------------------------------------------------------------------------
def _qkv_kernel(x_ref, w_ref, o_ref):
    # x_ref: (tn, D) bf16, w_ref: (3H, D, hd) bf16, o_ref: (3H, tn, hd) bf16
    x = x_ref[...]
    n_groups = w_ref.shape[0]
    # Static unrolled loop: one (tn, D) @ (D, hd) MXU matmul per (q|k|v, head)
    # group, stored directly to its output slab.  x stays live in vregs; no
    # (3H, tn, D) broadcast is ever materialized.
    for g in range(n_groups):
        og = jnp.dot(x, w_ref[g], preferred_element_type=jnp.float32)
        o_ref[g] = og.astype(o_ref.dtype)


# ---------------------------------------------------------------------------
# Kernel 2: flash attention (online softmax) + output projection.
# ---------------------------------------------------------------------------
def _make_flash_proj_kernel(scale: float):
    def kernel(q_ref, k_ref, v_ref, wp_ref, bp_ref, o_ref, m_s, l_s, acc_s):
        ki = pl.program_id(2)

        @pl.when(ki == 0)
        def _():
            m_s[...] = jnp.full_like(m_s, -jnp.inf)
            l_s[...] = jnp.zeros_like(l_s)
            acc_s[...] = jnp.zeros_like(acc_s)

        q = q_ref[...]                                   # (H, tq, hd) bf16
        k = k_ref[...]                                   # (H, tk, hd) bf16
        v = v_ref[...]                                   # (H, tk, hd) bf16

        # Head-batched scores on the MXU; accumulation + softmax math in f32.
        s = jnp.einsum("hqe,hke->hqk", q, k,
                       preferred_element_type=jnp.float32) * scale   # (H, tq, tk)

        m_prev = m_s[...]
        m_new = jnp.maximum(m_prev, jnp.max(s, axis=-1, keepdims=True))
        alpha = jnp.exp(m_prev - m_new)
        p = jnp.exp(s - m_new)
        l_s[...] = alpha * l_s[...] + jnp.sum(p, axis=-1, keepdims=True)
        acc_s[...] = alpha * acc_s[...] + jnp.einsum(
            "hqk,hke->hqe", p.astype(jnp.bfloat16), v,
            preferred_element_type=jnp.float32)                      # (H, tq, hd)
        m_s[...] = m_new

        @pl.when(ki == pl.num_programs(2) - 1)
        def _():
            attn = acc_s[...] * pl.reciprocal(l_s[...], approx=True)  # (H, tq, hd) f32
            tq, dmodel = o_ref.shape
            n_heads = wp_ref.shape[0]
            # Output projection folded in: sum_h attn[h] @ Wp[h], accumulated
            # directly into a single lane-dense (tq, D) f32 slab (no (H,tq,D)
            # intermediate).
            out = jnp.zeros((tq, dmodel), jnp.float32)
            for h in range(n_heads):
                out = out + jnp.dot(attn[h].astype(jnp.bfloat16), wp_ref[h],
                                    preferred_element_type=jnp.float32)
            out = out + bp_ref[...]
            o_ref[...] = out.astype(o_ref.dtype)

    return kernel


# ---------------------------------------------------------------------------
# Wrapper
# ---------------------------------------------------------------------------
def attention_forward(x, wqkv, wproj, bproj, *, num_heads: int):
    """Forward pass of the PyTorch Attention module (eval mode, dropout = identity).

    x:     (B, N, D) f32
    wqkv:  (D, 3D)   == qkv.weight.T  (no bias)
    wproj: (D, D)    == proj.weight.T
    bproj: (D,)      == proj.bias
    """
    B, N, D = x.shape
    H = num_heads
    hd = D // H
    assert hd * H == D, "hidden_size must be divisible by num_heads"
    scale = hd ** (-0.5)

    # Weight reorg (host/XLA side): qkv output features decompose as (3, H, hd)
    # exactly like the PyTorch reshape, so wqkv_r[g*H + h] is the (D, hd) slab
    # for (q|k|v) of head h.  bf16 storage halves VMEM/HBM footprint of weights.
    wqkv_r = (wqkv.reshape(D, 3, H, hd).transpose(1, 2, 0, 3)
              .reshape(3 * H, D, hd).astype(jnp.bfloat16))
    wproj_r = wproj.reshape(H, hd, D).astype(jnp.bfloat16)
    bproj_r = bproj.reshape(1, D).astype(jnp.float32)
    x_bf = x.astype(jnp.bfloat16)

    tn = _pick_tile(N)      # seq tile for the qkv projection
    tq = tk = tn            # query / kv tiles for flash attention
    nq, nk = N // tq, N // tk

    # ---- Kernel 1: QKV projection -----------------------------------------
    qkv_heads = pl.pallas_call(
        _qkv_kernel,
        out_shape=jax.ShapeDtypeStruct((B, 3 * H, N, hd), jnp.bfloat16),
        grid_spec=pltpu.PrefetchScalarGridSpec(
            num_scalar_prefetch=0,
            grid=(B, N // tn),
            in_specs=[
                pl.BlockSpec((pl.Squeezed(), tn, D), lambda b, t: (b, t, 0)),
                # NOTE: constant-index weight spec; double-buffering it is
                # pointless (it never changes across the grid).
                pl.BlockSpec((3 * H, D, hd), lambda b, t: (0, 0, 0)),
            ],
            out_specs=pl.BlockSpec((pl.Squeezed(), 3 * H, tn, hd),
                                   lambda b, t: (b, 0, t, 0)),
        ),
        compiler_params=pltpu.CompilerParams(
            dimension_semantics=("parallel", "parallel"),
            vmem_limit_bytes=_VMEM_LIMIT),
        cost_estimate=pl.CostEstimate(
            flops=int(2 * B * N * D * 3 * D),
            transcendentals=0,
            bytes_accessed=int(2 * B * N * D + 2 * 3 * D * D + 2 * 3 * B * N * D)),
    )(x_bf, wqkv_r)

    # ---- Kernel 2: flash attention + output projection ---------------------
    out = pl.pallas_call(
        _make_flash_proj_kernel(scale),
        out_shape=jax.ShapeDtypeStruct((B, N, D), x.dtype),
        grid_spec=pltpu.PrefetchScalarGridSpec(
            num_scalar_prefetch=0,
            grid=(B, nq, nk),
            in_specs=[
                # q tile: heads block [0, H) of dim 1
                pl.BlockSpec((pl.Squeezed(), H, tq, hd),
                             lambda b, qi, ki: (b, 0, qi, 0)),
                # k tile: heads block [H, 2H)
                pl.BlockSpec((pl.Squeezed(), H, tk, hd),
                             lambda b, qi, ki: (b, 1, ki, 0)),
                # v tile: heads block [2H, 3H)
                pl.BlockSpec((pl.Squeezed(), H, tk, hd),
                             lambda b, qi, ki: (b, 2, ki, 0)),
                # weights / bias resident across the whole grid
                pl.BlockSpec((H, hd, D), lambda b, qi, ki: (0, 0, 0)),
                pl.BlockSpec((1, D), lambda b, qi, ki: (0, 0)),
            ],
            out_specs=pl.BlockSpec((pl.Squeezed(), tq, D),
                                   lambda b, qi, ki: (b, qi, 0)),
            scratch_shapes=[
                pltpu.VMEM((H, tq, 1), jnp.float32),    # running max
                pltpu.VMEM((H, tq, 1), jnp.float32),    # running sum
                pltpu.VMEM((H, tq, hd), jnp.float32),   # f32 output accumulator
            ],
        ),
        compiler_params=pltpu.CompilerParams(
            dimension_semantics=("parallel", "parallel", "arbitrary"),
            vmem_limit_bytes=_VMEM_LIMIT),
        cost_estimate=pl.CostEstimate(
            flops=int(4 * B * H * N * N * hd + 2 * B * N * D * D),
            transcendentals=int(B * H * N * N),
            bytes_accessed=int(2 * B * N * D * (1 + 2 * nq) + 2 * D * D
                               + 4 * B * N * D)),
    )(qkv_heads, qkv_heads, qkv_heads, wproj_r, bproj_r)

    return out


# ---------------------------------------------------------------------------
# Pure-JAX reference matching the PyTorch module (eval mode).
# ---------------------------------------------------------------------------
def reference_attention(x, wqkv, wproj, bproj, *, num_heads: int):
    B, N, D = x.shape
    hd = D // num_heads
    qkv = x @ wqkv                                                    # (B, N, 3D)
    qkv = qkv.reshape(B, N, 3, num_heads, hd).transpose(2, 0, 3, 1, 4)
    q, k, v = qkv[0], qkv[1], qkv[2]
    s = jnp.einsum("bhqe,bhke->bhqk", q, k) * hd ** (-0.5)
    w = jax.nn.softmax(s, axis=-1)
    a = jnp.einsum("bhqk,bhke->bhqe", w, v)
    a = a.transpose(0, 2, 1, 3).reshape(B, N, D)
    return a @ wproj + bproj


if __name__ == "__main__":
    B, N, D = 2, 8, 32
    NUM_HEADS = 4

    key = jax.random.PRNGKey(0)
    kx, k1, k2 = jax.random.split(key, 3)
    x = jax.random.normal(kx, (B, N, D), jnp.float32)
    # Round weights to bf16 once so kernel (bf16 MXU inputs) and reference see
    # identical weights; remaining error is activation rounding only.
    wqkv = (0.05 * jax.random.normal(k1, (D, 3 * D), jnp.float32)
            ).astype(jnp.bfloat16).astype(jnp.float32)
    wproj = (0.05 * jax.random.normal(k2, (D, D), jnp.float32)
             ).astype(jnp.bfloat16).astype(jnp.float32)
    bproj = 0.01 * jnp.ones((D,), jnp.float32)

    out = attention_forward(x, wqkv, wproj, bproj, num_heads=NUM_HEADS)
    out = jax.block_until_ready(out)

    ref = reference_attention(x, wqkv, wproj, bproj, num_heads=NUM_HEADS)
    assert out.shape == (B, N, D)
    assert jnp.allclose(out, ref, atol=2e-2, rtol=2e-2), (
        f"mismatch vs reference, max abs err {jnp.max(jnp.abs(out - ref))}")

    print("KERNEL_OK")
</pallas_src>

<mosaic_0001>
module attributes {stable_mosaic.version = 11 : i64} {
  func.func @_qkv_kernel(%arg0: i32, %arg1: i32, %arg2: memref<1x8x32xbf16, #tpu.memory_space<vmem>>, %arg3: memref<12x32x8xbf16, #tpu.memory_space<vmem>>, %arg4: memref<1x12x8x8xbf16, #tpu.memory_space<vmem>>) attributes {dimension_semantics = [#tpu.dimension_semantics<parallel>, #tpu.dimension_semantics<parallel>], iteration_bounds = array<i64: 2, 1>, scalar_prefetch = 0 : i64, scratch_operands = 0 : i64, tpu.core_type = #tpu.core_type<tc>, window_params = [{transform_indices = @transform_0, window_bounds = array<i64: 1, 8, 32>}, {pipeline_mode = #tpu.pipeline_mode<synchronous>, transform_indices = @transform_1, window_bounds = array<i64: 12, 32, 8>}, {transform_indices = @transform_2, window_bounds = array<i64: 1, 12, 8, 8>}]} {
    %c0 = arith.constant 0 : index
    %c0_0 = arith.constant 0 : index
    %c0_1 = arith.constant 0 : index
    %0 = vector.load %arg2[%c0, %c0_0, %c0_1] : memref<1x8x32xbf16, #tpu.memory_space<vmem>>, vector<1x8x32xbf16>
    %1 = vector.shape_cast %0 : vector<1x8x32xbf16> to vector<8x32xbf16>
    %c0_2 = arith.constant 0 : index
    %c0_3 = arith.constant 0 : index
    %c0_4 = arith.constant 0 : index
    %2 = vector.load %arg3[%c0_2, %c0_3, %c0_4] : memref<12x32x8xbf16, #tpu.memory_space<vmem>>, vector<1x32x8xbf16>
    %3 = vector.shape_cast %2 : vector<1x32x8xbf16> to vector<32x8xbf16>
    %cst = arith.constant dense<0.000000e+00> : vector<8x8xf32>
    %4 = tpu.matmul %1, %3, %cst {dimension_numbers = #tpu.dot_dimension_numbers<[1], [0], [0], [1], [0, 0, 1, 1], [], []>} : vector<8x32xbf16>, vector<32x8xbf16>, vector<8x8xf32> -> vector<8x8xf32>
    %5 = arith.truncf %4 : vector<8x8xf32> to vector<8x8xbf16>
    %c0_5 = arith.constant 0 : index
    %c0_6 = arith.constant 0 : index
    %c0_7 = arith.constant 0 : index
    %c0_8 = arith.constant 0 : index
    %6 = vector.load %arg4[%c0_5, %c0_6, %c0_7, %c0_8] : memref<1x12x8x8xbf16, #tpu.memory_space<vmem>>, vector<1x1x8x8xbf16>
    %7 = vector.shape_cast %6 : vector<1x1x8x8xbf16> to vector<8x8xbf16>
    %8 = vector.shape_cast %5 : vector<8x8xbf16> to vector<1x1x8x8xbf16>
    tpu.vector_store %arg4[%c0_5, %c0_6, %c0_7, %c0_8], %8 {strides = array<i32>} : memref<1x12x8x8xbf16, #tpu.memory_space<vmem>>, vector<1x1x8x8xbf16>,
    %c1 = arith.constant 1 : index
    %c0_9 = arith.constant 0 : index
    %c0_10 = arith.constant 0 : index
    %9 = vector.load %arg3[%c1, %c0_9, %c0_10] : memref<12x32x8xbf16, #tpu.memory_space<vmem>>, vector<1x32x8xbf16>
    %10 = vector.shape_cast %9 : vector<1x32x8xbf16> to vector<32x8xbf16>
    %cst_11 = arith.constant dense<0.000000e+00> : vector<8x8xf32>
    %11 = tpu.matmul %1, %10, %cst_11 {dimension_numbers = #tpu.dot_dimension_numbers<[1], [0], [0], [1], [0, 0, 1, 1], [], []>} : vector<8x32xbf16>, vector<32x8xbf16>, vector<8x8xf32> -> vector<8x8xf32>
    %12 = arith.truncf %11 : vector<8x8xf32> to vector<8x8xbf16>
    %c0_12 = arith.constant 0 : index
    %c1_13 = arith.constant 1 : index
    %c0_14 = arith.constant 0 : index
    %c0_15 = arith.constant 0 : index
    %13 = vector.load %arg4[%c0_12, %c1_13, %c0_14, %c0_15] : memref<1x12x8x8xbf16, #tpu.memory_space<vmem>>, vector<1x1x8x8xbf16>
    %14 = vector.shape_cast %13 : vector<1x1x8x8xbf16> to vector<8x8xbf16>
    %15 = vector.shape_cast %12 : vector<8x8xbf16> to vector<1x1x8x8xbf16>
    tpu.vector_store %arg4[%c0_12, %c1_13, %c0_14, %c0_15], %15 {strides = array<i32>} : memref<1x12x8x8xbf16, #tpu.memory_space<vmem>>, vector<1x1x8x8xbf16>,
    %c2 = arith.constant 2 : index
    %c0_16 = arith.constant 0 : index
    %c0_17 = arith.constant 0 : index
    %16 = vector.load %arg3[%c2, %c0_16, %c0_17] : memref<12x32x8xbf16, #tpu.memory_space<vmem>>, vector<1x32x8xbf16>
    %17 = vector.shape_cast %16 : vector<1x32x8xbf16> to vector<32x8xbf16>
    %cst_18 = arith.constant dense<0.000000e+00> : vector<8x8xf32>
    %18 = tpu.matmul %1, %17, %cst_18 {dimension_numbers = #tpu.dot_dimension_numbers<[1], [0], [0], [1], [0, 0, 1, 1], [], []>} : vector<8x32xbf16>, vector<32x8xbf16>, vector<8x8xf32> -> vector<8x8xf32>
    %19 = arith.truncf %18 : vector<8x8xf32> to vector<8x8xbf16>
    %c0_19 = arith.constant 0 : index
    %c2_20 = arith.constant 2 : index
    %c0_21 = arith.constant 0 : index
    %c0_22 = arith.constant 0 : index
    %20 = vector.load %arg4[%c0_19, %c2_20, %c0_21, %c0_22] : memref<1x12x8x8xbf16, #tpu.memory_space<vmem>>, vector<1x1x8x8xbf16>
    %21 = vector.shape_cast %20 : vector<1x1x8x8xbf16> to vector<8x8xbf16>
    %22 = vector.shape_cast %19 : vector<8x8xbf16> to vector<1x1x8x8xbf16>
    tpu.vector_store %arg4[%c0_19, %c2_20, %c0_21, %c0_22], %22 {strides = array<i32>} : memref<1x12x8x8xbf16, #tpu.memory_space<vmem>>, vector<1x1x8x8xbf16>,
    %c3 = arith.constant 3 : index
    %c0_23 = arith.constant 0 : index
    %c0_24 = arith.constant 0 : index
    %23 = vector.load %arg3[%c3, %c0_23, %c0_24] : memref<12x32x8xbf16, #tpu.memory_space<vmem>>, vector<1x32x8xbf16>
    %24 = vector.shape_cast %23 : vector<1x32x8xbf16> to vector<32x8xbf16>
    %cst_25 = arith.constant dense<0.000000e+00> : vector<8x8xf32>
    %25 = tpu.matmul %1, %24, %cst_25 {dimension_numbers = #tpu.dot_dimension_numbers<[1], [0], [0], [1], [0, 0, 1, 1], [], []>} : vector<8x32xbf16>, vector<32x8xbf16>, vector<8x8xf32> -> vector<8x8xf32>
    %26 = arith.truncf %25 : vector<8x8xf32> to vector<8x8xbf16>
    %c0_26 = arith.constant 0 : index
    %c3_27 = arith.constant 3 : index
    %c0_28 = arith.constant 0 : index
    %c0_29 = arith.constant 0 : index
    %27 = vector.load %arg4[%c0_26, %c3_27, %c0_28, %c0_29] : memref<1x12x8x8xbf16, #tpu.memory_space<vmem>>, vector<1x1x8x8xbf16>
    %28 = vector.shape_cast %27 : vector<1x1x8x8xbf16> to vector<8x8xbf16>
    %29 = vector.shape_cast %26 : vector<8x8xbf16> to vector<1x1x8x8xbf16>
    tpu.vector_store %arg4[%c0_26, %c3_27, %c0_28, %c0_29], %29 {strides = array<i32>} : memref<1x12x8x8xbf16, #tpu.memory_space<vmem>>, vector<1x1x8x8xbf16>,
    %c4 = arith.constant 4 : index
    %c0_30 = arith.constant 0 : index
    %c0_31 = arith.constant 0 : index
    %30 = vector.load %arg3[%c4, %c0_30, %c0_31] : memref<12x32x8xbf16, #tpu.memory_space<vmem>>, vector<1x32x8xbf16>
    %31 = vector.shape_cast %30 : vector<1x32x8xbf16> to vector<32x8xbf16>
    %cst_32 = arith.constant dense<0.000000e+00> : vector<8x8xf32>
    %32 = tpu.matmul %1, %31, %cst_32 {dimension_numbers = #tpu.dot_dimension_numbers<[1], [0], [0], [1], [0, 0, 1, 1], [], []>} : vector<8x32xbf16>, vector<32x8xbf16>, vector<8x8xf32> -> vector<8x8xf32>
    %33 = arith.truncf %32 : vector<8x8xf32> to vector<8x8xbf16>
    %c0_33 = arith.constant 0 : index
    %c4_34 = arith.constant 4 : index
    %c0_35 = arith.constant 0 : index
    %c0_36 = arith.constant 0 : index
    %34 = vector.load %arg4[%c0_33, %c4_34, %c0_35, %c0_36] : memref<1x12x8x8xbf16, #tpu.memory_space<vmem>>, vector<1x1x8x8xbf16>
    %35 = vector.shape_cast %34 : vector<1x1x8x8xbf16> to vector<8x8xbf16>
    %36 = vector.shape_cast %33 : vector<8x8xbf16> to vector<1x1x8x8xbf16>
    tpu.vector_store %arg4[%c0_33, %c4_34, %c0_35, %c0_36], %36 {strides = array<i32>} : memref<1x12x8x8xbf16, #tpu.memory_space<vmem>>, vector<1x1x8x8xbf16>,
    %c5 = arith.constant 5 : index
    %c0_37 = arith.constant 0 : index
    %c0_38 = arith.constant 0 : index
    %37 = vector.load %arg3[%c5, %c0_37, %c0_38] : memref<12x32x8xbf16, #tpu.memory_space<vmem>>, vector<1x32x8xbf16>
    %38 = vector.shape_cast %37 : vector<1x32x8xbf16> to vector<32x8xbf16>
    %cst_39 = arith.constant dense<0.000000e+00> : vector<8x8xf32>
    %39 = tpu.matmul %1, %38, %cst_39 {dimension_numbers = #tpu.dot_dimension_numbers<[1], [0], [0], [1], [0, 0, 1, 1], [], []>} : vector<8x32xbf16>, vector<32x8xbf16>, vector<8x8xf32> -> vector<8x8xf32>
    %40 = arith.truncf %39 : vector<8x8xf32> to vector<8x8xbf16>
    %c0_40 = arith.constant 0 : index
    %c5_41 = arith.constant 5 : index
    %c0_42 = arith.constant 0 : index
    %c0_43 = arith.constant 0 : index
    %41 = vector.load %arg4[%c0_40, %c5_41, %c0_42, %c0_43] : memref<1x12x8x8xbf16, #tpu.memory_space<vmem>>, vector<1x1x8x8xbf16>
    %42 = vector.shape_cast %41 : vector<1x1x8x8xbf16> to vector<8x8xbf16>
    %43 = vector.shape_cast %40 : vector<8x8xbf16> to vector<1x1x8x8xbf16>
    tpu.vector_store %arg4[%c0_40, %c5_41, %c0_42, %c0_43], %43 {strides = array<i32>} : memref<1x12x8x8xbf16, #tpu.memory_space<vmem>>, vector<1x1x8x8xbf16>,
    %c6 = arith.constant 6 : index
    %c0_44 = arith.constant 0 : index
    %c0_45 = arith.constant 0 : index
    %44 = vector.load %arg3[%c6, %c0_44, %c0_45] : memref<12x32x8xbf16, #tpu.memory_space<vmem>>, vector<1x32x8xbf16>
    %45 = vector.shape_cast %44 : vector<1x32x8xbf16> to vector<32x8xbf16>
    %cst_46 = arith.constant dense<0.000000e+00> : vector<8x8xf32>
    %46 = tpu.matmul %1, %45, %cst_46 {dimension_numbers = #tpu.dot_dimension_numbers<[1], [0], [0], [1], [0, 0, 1, 1], [], []>} : vector<8x32xbf16>, vector<32x8xbf16>, vector<8x8xf32> -> vector<8x8xf32>
    %47 = arith.truncf %46 : vector<8x8xf32> to vector<8x8xbf16>
    %c0_47 = arith.constant 0 : index
    %c6_48 = arith.constant 6 : index
    %c0_49 = arith.constant 0 : index
    %c0_50 = arith.constant 0 : index
    %48 = vector.load %arg4[%c0_47, %c6_48, %c0_49, %c0_50] : memref<1x12x8x8xbf16, #tpu.memory_space<vmem>>, vector<1x1x8x8xbf16>
    %49 = vector.shape_cast %48 : vector<1x1x8x8xbf16> to vector<8x8xbf16>
    %50 = vector.shape_cast %47 : vector<8x8xbf16> to vector<1x1x8x8xbf16>
    tpu.vector_store %arg4[%c0_47, %c6_48, %c0_49, %c0_50], %50 {strides = array<i32>} : memref<1x12x8x8xbf16, #tpu.memory_space<vmem>>, vector<1x1x8x8xbf16>,
    %c7 = arith.constant 7 : index
    %c0_51 = arith.constant 0 : index
    %c0_52 = arith.constant 0 : index
    %51 = vector.load %arg3[%c7, %c0_51, %c0_52] : memref<12x32x8xbf16, #tpu.memory_space<vmem>>, vector<1x32x8xbf16>
    %52 = vector.shape_cast %51 : vector<1x32x8xbf16> to vector<32x8xbf16>
    %cst_53 = arith.constant dense<0.000000e+00> : vector<8x8xf32>
    %53 = tpu.matmul %1, %52, %cst_53 {dimension_numbers = #tpu.dot_dimension_numbers<[1], [0], [0], [1], [0, 0, 1, 1], [], []>} : vector<8x32xbf16>, vector<32x8xbf16>, vector<8x8xf32> -> vector<8x8xf32>
    %54 = arith.truncf %53 : vector<8x8xf32> to vector<8x8xbf16>
    %c0_54 = arith.constant 0 : index
    %c7_55 = arith.constant 7 : index
    %c0_56 = arith.constant 0 : index
    %c0_57 = arith.constant 0 : index
    %55 = vector.load %arg4[%c0_54, %c7_55, %c0_56, %c0_57] : memref<1x12x8x8xbf16, #tpu.memory_space<vmem>>, vector<1x1x8x8xbf16>
    %56 = vector.shape_cast %55 : vector<1x1x8x8xbf16> to vector<8x8xbf16>
    %57 = vector.shape_cast %54 : vector<8x8xbf16> to vector<1x1x8x8xbf16>
    tpu.vector_store %arg4[%c0_54, %c7_55, %c0_56, %c0_57], %57 {strides = array<i32>} : memref<1x12x8x8xbf16, #tpu.memory_space<vmem>>, vector<1x1x8x8xbf16>,
    %c8 = arith.constant 8 : index
    %c0_58 = arith.constant 0 : index
    %c0_59 = arith.constant 0 : index
    %58 = vector.load %arg3[%c8, %c0_58, %c0_59] : memref<12x32x8xbf16, #tpu.memory_space<vmem>>, vector<1x32x8xbf16>
    %59 = vector.shape_cast %58 : vector<1x32x8xbf16> to vector<32x8xbf16>
    %cst_60 = arith.constant dense<0.000000e+00> : vector<8x8xf32>
    %60 = tpu.matmul %1, %59, %cst_60 {dimension_numbers = #tpu.dot_dimension_numbers<[1], [0], [0], [1], [0, 0, 1, 1], [], []>} : vector<8x32xbf16>, vector<32x8xbf16>, vector<8x8xf32> -> vector<8x8xf32>
    %61 = arith.truncf %60 : vector<8x8xf32> to vector<8x8xbf16>
    %c0_61 = arith.constant 0 : index
    %c8_62 = arith.constant 8 : index
    %c0_63 = arith.constant 0 : index
    %c0_64 = arith.constant 0 : index
    %62 = vector.load %arg4[%c0_61, %c8_62, %c0_63, %c0_64] : memref<1x12x8x8xbf16, #tpu.memory_space<vmem>>, vector<1x1x8x8xbf16>
    %63 = vector.shape_cast %62 : vector<1x1x8x8xbf16> to vector<8x8xbf16>
    %64 = vector.shape_cast %61 : vector<8x8xbf16> to vector<1x1x8x8xbf16>
    tpu.vector_store %arg4[%c0_61, %c8_62, %c0_63, %c0_64], %64 {strides = array<i32>} : memref<1x12x8x8xbf16, #tpu.memory_space<vmem>>, vector<1x1x8x8xbf16>,
    %c9 = arith.constant 9 : index
    %c0_65 = arith.constant 0 : index
    %c0_66 = arith.constant 0 : index
    %65 = vector.load %arg3[%c9, %c0_65, %c0_66] : memref<12x32x8xbf16, #tpu.memory_space<vmem>>, vector<1x32x8xbf16>
    %66 = vector.shape_cast %65 : vector<1x32x8xbf16> to vector<32x8xbf16>
    %cst_67 = arith.constant dense<0.000000e+00> : vector<8x8xf32>
    %67 = tpu.matmul %1, %66, %cst_67 {dimension_numbers = #tpu.dot_dimension_numbers<[1], [0], [0], [1], [0, 0, 1, 1], [], []>} : vector<8x32xbf16>, vector<32x8xbf16>, vector<8x8xf32> -> vector<8x8xf32>
    %68 = arith.truncf %67 : vector<8x8xf32> to vector<8x8xbf16>
    %c0_68 = arith.constant 0 : index
    %c9_69 = arith.constant 9 : index
    %c0_70 = arith.constant 0 : index
    %c0_71 = arith.constant 0 : index
    %69 = vector.load %arg4[%c0_68, %c9_69, %c0_70, %c0_71] : memref<1x12x8x8xbf16, #tpu.memory_space<vmem>>, vector<1x1x8x8xbf16>
    %70 = vector.shape_cast %69 : vector<1x1x8x8xbf16> to vector<8x8xbf16>
    %71 = vector.shape_cast %68 : vector<8x8xbf16> to vector<1x1x8x8xbf16>
    tpu.vector_store %arg4[%c0_68, %c9_69, %c0_70, %c0_71], %71 {strides = array<i32>} : memref<1x12x8x8xbf16, #tpu.memory_space<vmem>>, vector<1x1x8x8xbf16>,
    %c10 = arith.constant 10 : index
    %c0_72 = arith.constant 0 : index
    %c0_73 = arith.constant 0 : index
    %72 = vector.load %arg3[%c10, %c0_72, %c0_73] : memref<12x32x8xbf16, #tpu.memory_space<vmem>>, vector<1x32x8xbf16>
    %73 = vector.shape_cast %72 : vector<1x32x8xbf16> to vector<32x8xbf16>
    %cst_74 = arith.constant dense<0.000000e+00> : vector<8x8xf32>
    %74 = tpu.matmul %1, %73, %cst_74 {dimension_numbers = #tpu.dot_dimension_numbers<[1], [0], [0], [1], [0, 0, 1, 1], [], []>} : vector<8x32xbf16>, vector<32x8xbf16>, vector<8x8xf32> -> vector<8x8xf32>
    %75 = arith.truncf %74 : vector<8x8xf32> to vector<8x8xbf16>
    %c0_75 = arith.constant 0 : index
    %c10_76 = arith.constant 10 : index
    %c0_77 = arith.constant 0 : index
    %c0_78 = arith.constant 0 : index
    %76 = vector.load %arg4[%c0_75, %c10_76, %c0_77, %c0_78] : memref<1x12x8x8xbf16, #tpu.memory_space<vmem>>, vector<1x1x8x8xbf16>
    %77 = vector.shape_cast %76 : vector<1x1x8x8xbf16> to vector<8x8xbf16>
    %78 = vector.shape_cast %75 : vector<8x8xbf16> to vector<1x1x8x8xbf16>
    tpu.vector_store %arg4[%c0_75, %c10_76, %c0_77, %c0_78], %78 {strides = array<i32>} : memref<1x12x8x8xbf16, #tpu.memory_space<vmem>>, vector<1x1x8x8xbf16>,
    %c11 = arith.constant 11 : index
    %c0_79 = arith.constant 0 : index
    %c0_80 = arith.constant 0 : index
    %79 = vector.load %arg3[%c11, %c0_79, %c0_80] : memref<12x32x8xbf16, #tpu.memory_space<vmem>>, vector<1x32x8xbf16>
    %80 = vector.shape_cast %79 : vector<1x32x8xbf16> to vector<32x8xbf16>
    %cst_81 = arith.constant dense<0.000000e+00> : vector<8x8xf32>
    %81 = tpu.matmul %1, %80, %cst_81 {dimension_numbers = #tpu.dot_dimension_numbers<[1], [0], [0], [1], [0, 0, 1, 1], [], []>} : vector<8x32xbf16>, vector<32x8xbf16>, vector<8x8xf32> -> vector<8x8xf32>
    %82 = arith.truncf %81 : vector<8x8xf32> to vector<8x8xbf16>
    %c0_82 = arith.constant 0 : index
    %c11_83 = arith.constant 11 : index
    %c0_84 = arith.constant 0 : index
    %c0_85 = arith.constant 0 : index
    %83 = vector.load %arg4[%c0_82, %c11_83, %c0_84, %c0_85] : memref<1x12x8x8xbf16, #tpu.memory_space<vmem>>, vector<1x1x8x8xbf16>
    %84 = vector.shape_cast %83 : vector<1x1x8x8xbf16> to vector<8x8xbf16>
    %85 = vector.shape_cast %82 : vector<8x8xbf16> to vector<1x1x8x8xbf16>
    tpu.vector_store %arg4[%c0_82, %c11_83, %c0_84, %c0_85], %85 {strides = array<i32>} : memref<1x12x8x8xbf16, #tpu.memory_space<vmem>>, vector<1x1x8x8xbf16>,
    return
  }
  func.func @transform_0(%arg0: i32, %arg1: i32) -> (i32, i32, i32) {
    %c0_i32 = arith.constant 0 : i32
    %c0_i32_0 = arith.constant 0 : i32
    return %arg0, %arg1, %c0_i32 : i32, i32, i32
  }
  func.func @transform_1(%arg0: i32, %arg1: i32) -> (i32, i32, i32) {
    %c0_i32 = arith.constant 0 : i32
    %c0_i32_0 = arith.constant 0 : i32
    %c0_i32_1 = arith.constant 0 : i32
    %c0_i32_2 = arith.constant 0 : i32
    return %c0_i32, %c0_i32_0, %c0_i32_1 : i32, i32, i32
  }
  func.func @transform_2(%arg0: i32, %arg1: i32) -> (i32, i32, i32, i32) {
    %c0_i32 = arith.constant 0 : i32
    %c0_i32_0 = arith.constant 0 : i32
    %c0_i32_1 = arith.constant 0 : i32
    return %arg0, %c0_i32, %arg1, %c0_i32_0 : i32, i32, i32, i32
  }
}

</mosaic_0001>

<bundles_post_ra>
// kernel: tpu_custom_call.1
= control target key start
LH: loop header
LB: loop body
LE: loop exit
PB: predicated region body
PF: predicated region fallthrough
CT: control target
= control target key end

     0   :  { %s1301_s9 = smov 0   ;;  %s1303_s10 = smov 0   ;;  %s1510_s0 = inlined_call_operand.vmem [shape: bf16[2,8,32], index: 0, kind: input, shape index: {}]   ;;  %s1511_s1 = inlined_call_operand.vmem [shape: bf16[12,32,8], index: 1, kind: input, shape index: {}]   ;;  %s1512_s2 = inlined_call_operand.vmem [shape: bf16[2,12,8,8], index: 2, kind: output, shape index: {}]  }
   0x1   :  { %s1305_s11 = smov 0  }
   0x2 LB: > { %s24_s12 = sadd.s32 1, %s1278_s10  ;;  %p981_p0 = scmp.ge.s32.totalorder %s1282_s11, 1  ;;  %s1282_s11 = sphi %s1305_s11, %s12_s11   ;;  %s1278_s10 = sphi %s1303_s10, %s1514_s10   ;;  %s1274_s9 = sphi %s1301_s9, %s1513_s9  }
   0x3   : > { %p26_p1 = scmp.ge.s32.totalorder %s24_s12, 2  ;;  %p130_p2 = scmp.lt.s32.totalorder %s1282_s11, 3 }
   0x5   : > { %s1516_s12 = smov (%p26_p1, %s24_s12), 0  ;;  %p131_p3 = pnand %p981_p0, %p130_p2 }
   0x6   : > { %v1236_v0 = vld [vmem:[%s1511_s1] sm:$0xff] (!%p131_p3)   ;;  %v1284_v1 = vmov (!%p131_p3), 0.0   ;;  %v1237_v2 = vld [vmem:[%s1511_s1 + $0x10] sm:$0xff] (!%p131_p3)   ;;  %v1238_v3 = vld [vmem:[%s1511_s1 + $0x8] sm:$0xff] (!%p131_p3)   ;;  %vm1285_vm0 = vmmov (!%p131_p3), 0   ;;  %p157_p4 = scmp.lt.s32.totalorder (!%p131_p3), %s1274_s9, 1 }
   0x7   : > { %134 = sbr.rel (%p131_p3) target bundleno = 273 (0x111), region = 28  ;;  %1113 = vmatprep.subr.bf16.mxu0 (!%p131_p3), %v1284_v1  ;;  %1121 = vmatprep.subr.bf16.mxu1 (!%p131_p3), %v1284_v1  ;;  %v1239_v4 = vld [vmem:[%s1511_s1 + $0x18] sm:$0xff] (!%p131_p3)   ;;  %vm190_vm1 = vcmask (!%p131_p3), 261120   ;;  %v1240_v5 = vld [vmem:[%s1511_s1 + $0x20] sm:$0xff] (!%p131_p3)   ;;  %v1241_v6 = vld [vmem:[%s1511_s1 + $0x30] sm:$0xff] (!%p131_p3)   ;;  %vm235_vm2 = vcmask (!%p131_p3), 60416  }
   0x8   : > { %1114 = vmatpush3.bf16.msra.mxu0 (!%p131_p3), %v1236_v0  ;;  %1117 = vmatprep.mubr.msk.bf16.mxu0 (!%p131_p3), %vm1285_vm0, %v1284_v1  ;;  %v1242_v8 = vld [vmem:[%s1511_s1 + $0x28] sm:$0xff] (!%p131_p3)   ;;  %v1243_v9 = vld [vmem:[%s1511_s1 + $0x38] sm:$0xff] (!%p131_p3)   ;;  %v1244_v10 = vld [vmem:[%s1511_s1 + $0x40] sm:$0xff] (!%p131_p3)  }
   0x9   : > { %1122 = vmatpush3.bf16.msra.mxu1 (!%p131_p3), %v1237_v2  ;;  %1115 = vmatprep.subr.bf16.mxu0 (!%p131_p3), %v1284_v1  ;;  %v1245_v11 = vld [vmem:[%s1511_s1 + $0x50] sm:$0xff] (!%p131_p3)   ;;  %v1246_v12 = vld [vmem:[%s1511_s1 + $0x48] sm:$0xff] (!%p131_p3)   ;;  %v1247_v13 = vld [vmem:[%s1511_s1 + $0x58] sm:$0xff] (!%p131_p3)  }
   0xa   : > { %1123 = vmatprep.subr.bf16.mxu1 (!%p131_p3), %v1284_v1  ;;  %1125 = vmatprep.mubr.msk.bf16.mxu1 (!%p131_p3), %vm1285_vm0, %v1284_v1  ;;  %v1248_v14 = vld [vmem:[%s1511_s1 + $0x60] sm:$0xff] (!%p131_p3)   ;;  %v1249_v15 = vld [vmem:[%s1511_s1 + $0x70] sm:$0xff] (!%p131_p3)   ;;  %v1250_v16 = vld [vmem:[%s1511_s1 + $0x68] sm:$0xff] (!%p131_p3)  }
   0xb   : > { %v1251_v17 = vld [vmem:[%s1511_s1 + $0x78] sm:$0xff] (!%p131_p3)   ;;  %v1252_v18 = vld [vmem:[%s1511_s1 + $0x80] sm:$0xff] (!%p131_p3)   ;;  %v1253_v19 = vld [vmem:[%s1511_s1 + $0x90] sm:$0xff] (!%p131_p3)  }
   0xc   : > { %1116 = vmatpush3.bf16.msra.mxu0 (!%p131_p3), %v1238_v3  ;;  %v1254_v20 = vld [vmem:[%s1511_s1 + $0x88] sm:$0xff] (!%p131_p3)   ;;  %v1255_v21 = vld [vmem:[%s1511_s1 + $0x98] sm:$0xff] (!%p131_p3)   ;;  %v1256_v22 = vld [vmem:[%s1511_s1 + $0xa0] sm:$0xff] (!%p131_p3)  }
   0xd   : > { %1124 = vmatpush3.bf16.msra.mxu1 (!%p131_p3), %v1239_v4  ;;  %1129 = vmatprep.subr.bf16.mxu0 (!%p131_p3), %v1284_v1  ;;  %v1257_v23 = vld [vmem:[%s1511_s1 + $0xb0] sm:$0xff] (!%p131_p3)   ;;  %v1258_v24 = vld [vmem:[%s1511_s1 + $0xa8] sm:$0xff] (!%p131_p3)   ;;  %v1259_v25 = vld [vmem:[%s1511_s1 + $0xb8] sm:$0xff] (!%p131_p3)  }
   0xe   : > { %s1518_s9 = smov (!%p157_p4, %s1274_s9), 1  ;;  %1137 = vmatprep.subr.bf16.mxu1 %v1284_v1 }
   0xf   : > { %s982_s21 = sshll.u32 %s1518_s9, 2  ;;  %s1209_s17 = smul.u32 48, %s1518_s9 }
  0x10   : > { %s163_s26 = scalar_lea.vmem %s1510_s0, %s982_s21 }
  0x11   : > { %v1352_v7 = vld [vmem:[%s163_s26] sm:$0xf]  ;;  %s1475_s20 = scalar_lea.vmem %s1512_s2, %s1209_s17 }
  0x12   : > { %1118 = vmatmul.mubr.msk.bf16.vlgmr.msra.gmra.mrb[0].mxu0 %vm190_vm1, %v1352_v7  ;;  %1126 = vmatmul.mubr.msk.bf16.vlgmr.msra.gmra.mrb[0].mxu1 %vm190_vm1, %v1352_v7 }
  0x13   : > { %1130 = vmatpush3.bf16.msra.mxu0 %v1240_v5  ;;  %1138 = vmatpush3.bf16.msra.mxu1 %v1241_v6 }
  0x14   : > { %1131 = vmatprep.subr.bf16.mxu0 %v1284_v1  ;;  %1139 = vmatprep.subr.bf16.mxu1 %v1284_v1 }
  0x15   : > { %1133 = vmatprep.mubr.msk.bf16.mxu0 %vm1285_vm0, %v1284_v1  ;;  %1141 = vmatprep.mubr.msk.bf16.mxu1 %vm1285_vm0, %v1284_v1 }
  0x17   : > { %1132 = vmatpush3.bf16.msra.mxu0 %v1242_v8  ;;  %1140 = vmatpush3.bf16.msra.mxu1 %v1243_v9 }
  0x18   : > { %1145 = vmatprep.subr.bf16.mxu0 %v1284_v1  ;;  %1153 = vmatprep.subr.bf16.mxu1 %v1284_v1 }
  0x1a   : > { %1134 = vmatmul.mubr.msk.bf16.vlgmr.msra.gmra.mrb[4].mxu0 %vm190_vm1, %v1352_v7  ;;  %1142 = vmatmul.mubr.msk.bf16.vlgmr.msra.gmra.mrb[4].mxu1 %vm190_vm1, %v1352_v7 }
  0x1b   : > { %1146 = vmatpush3.bf16.msra.mxu0 %v1244_v10  ;;  %1154 = vmatpush3.bf16.msra.mxu1 %v1245_v11 }
  0x1c   : > { %1147 = vmatprep.subr.bf16.mxu0 %v1284_v1  ;;  %1155 = vmatprep.subr.bf16.mxu1 %v1284_v1 }
  0x1d   : > { %1149 = vmatprep.mubr.msk.bf16.mxu0 %vm1285_vm0, %v1284_v1  ;;  %1157 = vmatprep.mubr.msk.bf16.mxu1 %vm1285_vm0, %v1284_v1 }
  0x1f   : > { %1148 = vmatpush3.bf16.msra.mxu0 %v1246_v12  ;;  %1156 = vmatpush3.bf16.msra.mxu1 %v1247_v13 }
  0x20   : > { %1161 = vmatprep.subr.bf16.mxu0 %v1284_v1  ;;  %1169 = vmatprep.subr.bf16.mxu1 %v1284_v1 }
  0x22   : > { %1150 = vmatmul.mubr.msk.bf16.vlgmr.msra.gmra.mrb[8].mxu0 %vm190_vm1, %v1352_v7  ;;  %1158 = vmatmul.mubr.msk.bf16.vlgmr.msra.gmra.mrb[8].mxu1 %vm190_vm1, %v1352_v7 }
  0x23   : > { %1162 = vmatpush3.bf16.msra.mxu0 %v1248_v14  ;;  %1170 = vmatpush3.bf16.msra.mxu1 %v1249_v15 }
  0x24   : > { %1163 = vmatprep.subr.bf16.mxu0 %v1284_v1  ;;  %1171 = vmatprep.subr.bf16.mxu1 %v1284_v1 }
  0x25   : > { %1165 = vmatprep.mubr.msk.bf16.mxu0 %vm1285_vm0, %v1284_v1  ;;  %1173 = vmatprep.mubr.msk.bf16.mxu1 %vm1285_vm0, %v1284_v1 }
  0x27   : > { %1164 = vmatpush3.bf16.msra.mxu0 %v1250_v16  ;;  %1172 = vmatpush3.bf16.msra.mxu1 %v1251_v17 }
  0x28   : > { %1177 = vmatprep.subr.bf16.mxu0 %v1284_v1  ;;  %1185 = vmatprep.subr.bf16.mxu1 %v1284_v1 }
  0x2a   : > { %1166 = vmatmul.mubr.msk.bf16.vlgmr.msra.gmra.mrb[12].mxu0 %vm190_vm1, %v1352_v7  ;;  %1174 = vmatmul.mubr.msk.bf16.vlgmr.msra.gmra.mrb[12].mxu1 %vm190_vm1, %v1352_v7 }
  0x2b   : > { %1178 = vmatpush3.bf16.msra.mxu0 %v1252_v18  ;;  %1186 = vmatpush3.bf16.msra.mxu1 %v1253_v19 }
  0x2c   : > { %1179 = vmatprep.subr.bf16.mxu0 %v1284_v1  ;;  %1187 = vmatprep.subr.bf16.mxu1 %v1284_v1 }
  0x2d   : > { %1181 = vmatprep.mubr.msk.bf16.mxu0 %vm1285_vm0, %v1284_v1  ;;  %1189 = vmatprep.mubr.msk.bf16.mxu1 %vm1285_vm0, %v1284_v1 }
  0x2f   : > { %1180 = vmatpush3.bf16.msra.mxu0 %v1254_v20  ;;  %1188 = vmatpush3.bf16.msra.mxu1 %v1255_v21 }
  0x30   : > { %1193 = vmatprep.subr.bf16.mxu0 %v1284_v1  ;;  %1201 = vmatprep.subr.bf16.mxu1 %v1284_v1 }
  0x32   : > { %1182 = vmatmul.mubr.msk.bf16.vlgmr.msra.gmra.mrb[16].mxu0 %vm190_vm1, %v1352_v7  ;;  %1190 = vmatmul.mubr.msk.bf16.vlgmr.msra.gmra.mrb[16].mxu1 %vm190_vm1, %v1352_v7 }
  0x33   : > { %1194 = vmatpush3.bf16.msra.mxu0 %v1256_v22  ;;  %1202 = vmatpush3.bf16.msra.mxu1 %v1257_v23 }
  0x34   : > { %1195 = vmatprep.subr.bf16.mxu0 %v1284_v1  ;;  %1203 = vmatprep.subr.bf16.mxu1 %v1284_v1 }
  0x35   : > { %1197 = vmatprep.mubr.msk.bf16.mxu0 %vm1285_vm0, %v1284_v1  ;;  %1205 = vmatprep.mubr.msk.bf16.mxu1 %vm1285_vm0, %v1284_v1 }
  0x37   : > { %1196 = vmatpush3.bf16.msra.mxu0 %v1258_v24  ;;  %1204 = vmatpush3.bf16.msra.mxu1 %v1259_v25 }
  0x3a   : > { %1198 = vmatmul.mubr.msk.bf16.vlgmr.msra.gmra.mrb[20].mxu0 %vm190_vm1, %v1352_v7  ;;  %1206 = vmatmul.mubr.msk.bf16.vlgmr.msra.gmra.mrb[20].mxu1 %vm190_vm1, %v1352_v7 }
  0xe5   : > { %v228_v26 = vpop.f32.mrb[0].mxu0  ;;  %v288_v28 = vpop.f32.mrb[0].mxu1 }
  0xe6   : > { %v234_v27 = vpack.c.bf16 %v228_v26, %v228_v26  ;;  %v1119_v29 = vpop.f32.mrb[1].mxu0  ;;  %v294_v30 = vpack.c.bf16 %v288_v28, %v288_v28  ;;  %v1127_v31 = vpop.f32.mrb[1].mxu1 }
  0xe7   : > { %v231_v32 = vpop.f32.mrb[2].mxu0  ;;  %v291_v33 = vpop.f32.mrb[2].mxu1 }
  0xe8   : > { %236 = vst.msk [vmem:[%s1475_s20] sm:$0xf] %vm235_vm2, %v234_v27  ;;  %v1120_v34 = vpop.f32.mrb[3].mxu0  ;;  %994 = vst.msk [vmem:[%s1475_s20 + $0x4] sm:$0xf] %vm235_vm2, %v294_v30  ;;  %v1128_v35 = vpop.f32.mrb[3].mxu1 }
  0xed   : > { %v348_v36 = vpop.f32.mrb[4].mxu0  ;;  %v408_v38 = vpop.f32.mrb[4].mxu1 }
  0xee   : > { %v354_v37 = vpack.c.bf16 %v348_v36, %v348_v36  ;;  %v1135_v39 = vpop.f32.mrb[5].mxu0  ;;  %v414_v40 = vpack.c.bf16 %v408_v38, %v408_v38  ;;  %v1143_v41 = vpop.f32.mrb[5].mxu1 }
  0xef   : > { %v351_v42 = vpop.f32.mrb[6].mxu0  ;;  %v411_v43 = vpop.f32.mrb[6].mxu1 }
  0xf0   : > { %1002 = vst.msk [vmem:[%s1475_s20 + $0x8] sm:$0xf] %vm235_vm2, %v354_v37  ;;  %v1136_v44 = vpop.f32.mrb[7].mxu0  ;;  %1010 = vst.msk [vmem:[%s1475_s20 + $0xc] sm:$0xf] %vm235_vm2, %v414_v40  ;;  %v1144_v45 = vpop.f32.mrb[7].mxu1 }
  0xf5   : > { %v468_v46 = vpop.f32.mrb[8].mxu0  ;;  %v528_v48 = vpop.f32.mrb[8].mxu1 }
  0xf6   : > { %v474_v47 = vpack.c.bf16 %v468_v46, %v468_v46  ;;  %v1151_v49 = vpop.f32.mrb[9].mxu0  ;;  %v534_v50 = vpack.c.bf16 %v528_v48, %v528_v48  ;;  %v1159_v51 = vpop.f32.mrb[9].mxu1 }
  0xf7   : > { %v471_v52 = vpop.f32.mrb[10].mxu0  ;;  %v531_v53 = vpop.f32.mrb[10].mxu1 }
  0xf8   : > { %1018 = vst.msk [vmem:[%s1475_s20 + $0x10] sm:$0xf] %vm235_vm2, %v474_v47  ;;  %v1152_v54 = vpop.f32.mrb[11].mxu0  ;;  %1026 = vst.msk [vmem:[%s1475_s20 + $0x14] sm:$0xf] %vm235_vm2, %v534_v50  ;;  %v1160_v55 = vpop.f32.mrb[11].mxu1 }
  0xfd   : > { %v588_v56 = vpop.f32.mrb[12].mxu0  ;;  %v648_v58 = vpop.f32.mrb[12].mxu1 }
  0xfe   : > { %v594_v57 = vpack.c.bf16 %v588_v56, %v588_v56  ;;  %v1167_v59 = vpop.f32.mrb[13].mxu0  ;;  %v654_v60 = vpack.c.bf16 %v648_v58, %v648_v58  ;;  %v1175_v61 = vpop.f32.mrb[13].mxu1 }
  0xff   : > { %v591_v62 = vpop.f32.mrb[14].mxu0  ;;  %v651_v63 = vpop.f32.mrb[14].mxu1 }
 0x100   : > { %1034 = vst.msk [vmem:[%s1475_s20 + $0x18] sm:$0xf] %vm235_vm2, %v594_v57  ;;  %v1168_v0 = vpop.f32.mrb[15].mxu0  ;;  %1042 = vst.msk [vmem:[%s1475_s20 + $0x1c] sm:$0xf] %vm235_vm2, %v654_v60  ;;  %v1176_v1 = vpop.f32.mrb[15].mxu1 }
 0x105   : > { %v708_v2 = vpop.f32.mrb[16].mxu0  ;;  %v768_v4 = vpop.f32.mrb[16].mxu1 }
 0x106   : > { %v714_v3 = vpack.c.bf16 %v708_v2, %v708_v2  ;;  %v1183_v5 = vpop.f32.mrb[17].mxu0  ;;  %v774_v6 = vpack.c.bf16 %v768_v4, %v768_v4  ;;  %v1191_v7 = vpop.f32.mrb[17].mxu1 }
 0x107   : > { %v711_v8 = vpop.f32.mrb[18].mxu0  ;;  %v771_v9 = vpop.f32.mrb[18].mxu1 }
 0x108   : > { %1050 = vst.msk [vmem:[%s1475_s20 + $0x20] sm:$0xf] %vm235_vm2, %v714_v3  ;;  %v1184_v10 = vpop.f32.mrb[19].mxu0  ;;  %1058 = vst.msk [vmem:[%s1475_s20 + $0x24] sm:$0xf] %vm235_vm2, %v774_v6  ;;  %v1192_v11 = vpop.f32.mrb[19].mxu1 }
 0x10d   : > { %v828_v12 = vpop.f32.mrb[20].mxu0  ;;  %v888_v14 = vpop.f32.mrb[20].mxu1 }
 0x10e   : > { %v834_v13 = vpack.c.bf16 %v828_v12, %v828_v12  ;;  %v1199_v15 = vpop.f32.mrb[21].mxu0  ;;  %v894_v16 = vpack.c.bf16 %v888_v14, %v888_v14  ;;  %v1207_v17 = vpop.f32.mrb[21].mxu1 }
 0x10f   : > { %v831_v18 = vpop.f32.mrb[22].mxu0  ;;  %v891_v19 = vpop.f32.mrb[22].mxu1 }
 0x110   : > { %1066 = vst.msk [vmem:[%s1475_s20 + $0x28] sm:$0xf] %vm235_vm2, %v834_v13  ;;  %v1200_v20 = vpop.f32.mrb[23].mxu0  ;;  %1074 = vst.msk [vmem:[%s1475_s20 + $0x2c] sm:$0xf] %vm235_vm2, %v894_v16  ;;  %v1208_v21 = vpop.f32.mrb[23].mxu1 }
 0x111 PF: > { %s12_s11 = sadd.s32 1, %s1282_s11   ;;  %s1513_s9 = smov %s1278_s10 }
 0x112   : > { %p9_p5 = scmp.ge.s32.totalorder %s12_s11, 4   ;;  %s1514_s10 = smov %s1516_s12 }
 0x114   :  { %11 = sbr.rel (!%p9_p5) target bundleno = 2 (0x2), region = 80 }

</bundles_post_ra>
